<compile_context>
chip_gen: v5e
topology: v5e:2x2
jax: 0.10.0
libtpu: 0.0.40
codegen_flags: <defaults>
</compile_context>

<pallas_src>
import functools

import jax
import jax.numpy as jnp
from jax.experimental import pallas as pl
from jax.experimental.pallas import tpu as pltpu


# ------------------------------ fused kernel --------------------------------
def _resblock_kernel(x_ref, s1_ref, b1_ref, w2a_ref, s2a_ref, b2a_ref, w2b_ref,
                     *refs, H1, W1, C1, Ho, Wo, Cmid, Cout, KH1, KW1,
                     pad_t, pad_l, has_down):
    """Fused ResBlock forward for one batch element (one grid step)."""
    if has_down:
        wres_ref, o_ref, b1p_ref, b2p_ref = refs
    else:
        o_ref, b1p_ref, b2p_ref = refs

    # ---- branch1: BN1 + ReLU (f32), written into a zero-padded VMEM scratch
    x = x_ref[0]                                               # (H1, W1, C1)
    br1 = jnp.maximum(x * s1_ref[0] + b1_ref[0], 0.0)
    b1p_ref[...] = jnp.zeros_like(b1p_ref)
    b1p_ref[pad_t:pad_t + H1, pad_l:pad_l + W1, :] = br1

    # ---- branch2a: conv as KH1*KW1 shifted MXU matmuls + BN2a + ReLU --------
    acc = jnp.zeros((Ho * Wo, Cmid), jnp.float32)
    for t in range(KH1 * KW1):                 # static unroll, taps are consts
        dh, dw = divmod(t, KW1)
        patch = b1p_ref[dh:dh + Ho, dw:dw + Wo, :]             # (Ho, Wo, C1)
        a = patch.reshape(Ho * Wo, C1).astype(jnp.bfloat16)
        acc = acc + jnp.dot(a, w2a_ref[t], preferred_element_type=jnp.float32)
    br2 = jnp.maximum(acc * s2a_ref[0] + b2a_ref[0], 0.0)      # f32 epilogue
    # TODO(synk): Dropout2d with rate > 0 (training mode) not implemented; the
    # module default rate=0.0 is an identity so nothing is needed here.
    b2p_ref[...] = jnp.zeros_like(b2p_ref)
    b2p_ref[1:1 + Ho, 1:1 + Wo, :] = br2.reshape(Ho, Wo, Cmid)

    # ---- residual path: 1x1 downsample conv (or identity), fused in VMEM ---
    if has_down:
        a1 = br1.reshape(H1 * W1, C1).astype(jnp.bfloat16)
        out = jnp.dot(a1, wres_ref[...], preferred_element_type=jnp.float32)
    else:
        out = br1.reshape(Ho * Wo, Cout)

    # ---- branch2b: 3x3 conv (stride 1) + fused residual add ----------------
    for t in range(9):
        dh, dw = divmod(t, 3)
        patch = b2p_ref[dh:dh + Ho, dw:dw + Wo, :]             # (Ho, Wo, Cmid)
        a = patch.reshape(Ho * Wo, Cmid).astype(jnp.bfloat16)
        out = out + jnp.dot(a, w2b_ref[t], preferred_element_type=jnp.float32)

    o_ref[0] = out.reshape(Ho, Wo, Cout)


# ------------------------- wrapper-side preparation --------------------------
def _bn_fold(gamma, beta, mean, var, eps=1e-5):
    scale = gamma / jnp.sqrt(var + eps)
    bias = beta - mean * scale
    return (scale.reshape(1, -1).astype(jnp.float32),
            bias.reshape(1, -1).astype(jnp.float32))


def _prep_conv2a(w, stride):
    """(Cmid, Cin, 3, 3) conv weight -> per-tap matmul weights (T, C1, Cmid).

    stride == 1: (kh, kw) taps over Cin channels.
    stride == 2: space-to-depth rewrite: stride-2 3x3 over Cin becomes a
                 stride-1 2x2 over 4*Cin channels ordered (ph, pw, ci);
                 tap mapping kh -> (dh, p) with (dh, p) = divmod(kh + 1, 2).
    """
    co, ci, kh, kw = w.shape
    if stride == 1:
        mat = jnp.transpose(w, (2, 3, 1, 0)).reshape(kh * kw, ci, co)
        return mat.astype(jnp.bfloat16), kh, kw
    ws = jnp.zeros((co, 2, 2, 2, 2, ci), w.dtype)
    for ih in range(kh):
        dh, ph = divmod(ih + 1, 2)
        for iw in range(kw):
            dw, pw = divmod(iw + 1, 2)
            ws = ws.at[:, dh, dw, ph, pw, :].set(w[:, :, ih, iw])
    mat = jnp.transpose(ws, (1, 2, 3, 4, 5, 0)).reshape(4, 4 * ci, co)
    return mat.astype(jnp.bfloat16), 2, 2


def _prep_conv2b(w):
    co, ci, kh, kw = w.shape
    return (jnp.transpose(w, (2, 3, 1, 0))
            .reshape(kh * kw, ci, co).astype(jnp.bfloat16))


def _prep_down(w, stride):
    """(Cout, Cin, 1, 1) downsample weight -> (C1, Cout) residual matmul."""
    co, ci = w.shape[:2]
    wm = jnp.transpose(w[:, :, 0, 0])                          # (Cin, Cout)
    if stride == 1:
        return wm.astype(jnp.bfloat16)
    # stride 2 + space-to-depth: only the (ph, pw) = (0, 0) phase contributes.
    ws = jnp.zeros((2, 2, ci, co), w.dtype).at[0, 0].set(wm)
    return ws.reshape(4 * ci, co).astype(jnp.bfloat16)


# ------------------------------ ResBlock forward -----------------------------
def res_block_forward(x_nchw, params, stride):
    assert stride in (1, 2)
    N, Cin, H, W = x_nchw.shape
    Cmid = params["conv2a_w"].shape[0]
    Cout = params["conv2b_w"].shape[0]
    has_down = params.get("down_w") is not None
    if not has_down:
        assert stride == 1 and Cin == Cout, (
            "identity residual requires stride == 1 and Cin == Cout")

    x = jnp.transpose(x_nchw, (0, 2, 3, 1)).astype(jnp.float32)   # NCHW -> NHWC
    s1, b1 = _bn_fold(params["bn1_gamma"], params["bn1_beta"],
                      params["bn1_mean"], params["bn1_var"])
    s2a, b2a = _bn_fold(params["bn2a_gamma"], params["bn2a_beta"],
                        params["bn2a_mean"], params["bn2a_var"])

    if stride == 2:
        assert H % 2 == 0 and W % 2 == 0
        H1, W1, C1 = H // 2, W // 2, 4 * Cin
        # space-to-depth so the in-kernel conv is stride-1 / contiguous slices
        x = (x.reshape(N, H1, 2, W1, 2, Cin)
               .transpose(0, 1, 3, 2, 4, 5)
               .reshape(N, H1, W1, C1))
        s1, b1 = jnp.tile(s1, 4), jnp.tile(b1, 4)
        pad_b, pad_r = 0, 0            # only top/left padding needed after s2d
    else:
        H1, W1, C1 = H, W, Cin
        pad_b, pad_r = 1, 1
    pad_t, pad_l = 1, 1
    Ho, Wo = H1, W1

    w2a, KH1, KW1 = _prep_conv2a(params["conv2a_w"], stride)
    w2b = _prep_conv2b(params["conv2b_w"])

    inputs = [x, s1, b1, w2a, s2a, b2a, w2b]
    in_specs = [
        pl.BlockSpec((1, H1, W1, C1), lambda n: (n, 0, 0, 0)),
        # constant index_maps -> weights / BN params stay VMEM-resident
        pl.BlockSpec(s1.shape, lambda n: (0, 0)),
        pl.BlockSpec(b1.shape, lambda n: (0, 0)),
        pl.BlockSpec(w2a.shape, lambda n: (0, 0, 0)),
        pl.BlockSpec(s2a.shape, lambda n: (0, 0)),
        pl.BlockSpec(b2a.shape, lambda n: (0, 0)),
        pl.BlockSpec(w2b.shape, lambda n: (0, 0, 0)),
    ]
    if has_down:
        wres = _prep_down(params["down_w"], stride)
        inputs.append(wres)
        in_specs.append(pl.BlockSpec(wres.shape, lambda n: (0, 0)))

    kernel = functools.partial(
        _resblock_kernel, H1=H1, W1=W1, C1=C1, Ho=Ho, Wo=Wo, Cmid=Cmid,
        Cout=Cout, KH1=KH1, KW1=KW1, pad_t=pad_t, pad_l=pad_l,
        has_down=has_down)

    out_nhwc = pl.pallas_call(
        kernel,
        out_shape=jax.ShapeDtypeStruct((N, Ho, Wo, Cout), jnp.float32),
        grid=(N,),
        in_specs=in_specs,
        out_specs=pl.BlockSpec((1, Ho, Wo, Cout), lambda n: (n, 0, 0, 0)),
        scratch_shapes=[
            pltpu.VMEM((pad_t + H1 + pad_b, pad_l + W1 + pad_r, C1), jnp.float32),
            pltpu.VMEM((Ho + 2, Wo + 2, Cmid), jnp.float32),
        ],
        compiler_params=pltpu.CompilerParams(
            dimension_semantics=("parallel",)),
    )(*inputs)

    return jnp.transpose(out_nhwc, (0, 3, 1, 2))     # NHWC -> NCHW


# ---------------------------- deterministic params ---------------------------
def init_params(key, cin, cmid, cout, stride):
    ks = jax.random.split(key, 11)
    return {
        "bn1_gamma": jax.random.uniform(ks[0], (cin,), minval=0.5, maxval=1.5),
        "bn1_beta": 0.1 * jax.random.normal(ks[1], (cin,)),
        "bn1_mean": 0.1 * jax.random.normal(ks[2], (cin,)),
        "bn1_var": jax.random.uniform(ks[3], (cin,), minval=0.5, maxval=1.5),
        "conv2a_w": 0.1 * jax.random.normal(ks[4], (cmid, cin, 3, 3)),
        "bn2a_gamma": jax.random.uniform(ks[5], (cmid,), minval=0.5, maxval=1.5),
        "bn2a_beta": 0.1 * jax.random.normal(ks[6], (cmid,)),
        "bn2a_mean": 0.1 * jax.random.normal(ks[7], (cmid,)),
        "bn2a_var": jax.random.uniform(ks[8], (cmid,), minval=0.5, maxval=1.5),
        "conv2b_w": 0.1 * jax.random.normal(ks[9], (cout, cmid, 3, 3)),
        "down_w": (0.1 * jax.random.normal(ks[10], (cout, cin, 1, 1))
                   if (cin != cout or stride == 2) else None),
    }


# -------------------------------- pure-JAX ref --------------------------------
def _ref_forward(x, p, stride):
    def bn(y, g, b, m, v, eps=1e-5):
        rs = lambda a: a.reshape(1, -1, 1, 1)
        return (y - rs(m)) / jnp.sqrt(rs(v) + eps) * rs(g) + rs(b)

    def conv(y, w, s, pad):
        return jax.lax.conv_general_dilated(
            y, w, (s, s), ((pad, pad), (pad, pad)),
            dimension_numbers=("NCHW", "OIHW", "NCHW"),
            precision=jax.lax.Precision.HIGHEST)

    b1 = jnp.maximum(bn(x, p["bn1_gamma"], p["bn1_beta"],
                        p["bn1_mean"], p["bn1_var"]), 0.0)
    b2 = conv(b1, p["conv2a_w"], stride, 1)
    b2 = jnp.maximum(bn(b2, p["bn2a_gamma"], p["bn2a_beta"],
                        p["bn2a_mean"], p["bn2a_var"]), 0.0)
    b2 = conv(b2, p["conv2b_w"], 1, 1)
    res = conv(b1, p["down_w"], stride, 0) if p["down_w"] is not None else b1
    return b2 + res


if __name__ == "__main__":
    key = jax.random.PRNGKey(0)
    fwd = jax.jit(res_block_forward, static_argnums=(2,))
    configs = [
        # (cin, cmid, cout, stride) -- first is the primary small config
        (4, 8, 8, 2),    # strided block, 1x1 downsample residual
        (8, 8, 8, 1),    # identity residual
        (4, 8, 8, 1),    # channel-changing downsample, stride 1
    ]
    for cin, cmid, cout, stride in configs:
        key, k_x, k_p = jax.random.split(key, 3)
        x = jax.random.normal(k_x, (2, cin, 16, 16), dtype=jnp.float32)
        params = init_params(k_p, cin, cmid, cout, stride)

        out = jax.block_until_ready(fwd(x, params, stride))
        ref = jax.block_until_ready(_ref_forward(x, params, stride))

        assert out.shape == ref.shape, (out.shape, ref.shape)
        # bf16 MXU operands (f32 accumulation) -> tolerance relaxed vs pure f32
        assert jnp.allclose(out, ref, rtol=2e-2, atol=2e-2), \
            float(jnp.max(jnp.abs(out - ref)))
    print("KERNEL_OK")
</pallas_src>

<mosaic_0001>
module attributes {stable_mosaic.version = 11 : i64} {
  func.func @_resblock_kernel(%arg0: i32, %arg1: memref<1x8x8x16xf32, #tpu.memory_space<vmem>>, %arg2: memref<1x16xf32, #tpu.memory_space<vmem>>, %arg3: memref<1x16xf32, #tpu.memory_space<vmem>>, %arg4: memref<4x16x8xbf16, #tpu.memory_space<vmem>>, %arg5: memref<1x8xf32, #tpu.memory_space<vmem>>, %arg6: memref<1x8xf32, #tpu.memory_space<vmem>>, %arg7: memref<9x8x8xbf16, #tpu.memory_space<vmem>>, %arg8: memref<16x8xbf16, #tpu.memory_space<vmem>>, %arg9: memref<1x8x8x8xf32, #tpu.memory_space<vmem>>, %arg10: memref<9x9x16xf32, #tpu.memory_space<vmem>>, %arg11: memref<10x10x8xf32, #tpu.memory_space<vmem>>) attributes {dimension_semantics = [#tpu.dimension_semantics<parallel>], iteration_bounds = array<i64: 2>, scalar_prefetch = 0 : i64, scratch_operands = 2 : i64, tpu.core_type = #tpu.core_type<tc>, window_params = [{transform_indices = @transform_0, window_bounds = array<i64: 1, 8, 8, 16>}, {pipeline_mode = #tpu.pipeline_mode<synchronous>, transform_indices = @transform_1, window_bounds = array<i64: 1, 16>}, {pipeline_mode = #tpu.pipeline_mode<synchronous>, transform_indices = @transform_2, window_bounds = array<i64: 1, 16>}, {pipeline_mode = #tpu.pipeline_mode<synchronous>, transform_indices = @transform_3, window_bounds = array<i64: 4, 16, 8>}, {pipeline_mode = #tpu.pipeline_mode<synchronous>, transform_indices = @transform_4, window_bounds = array<i64: 1, 8>}, {pipeline_mode = #tpu.pipeline_mode<synchronous>, transform_indices = @transform_5, window_bounds = array<i64: 1, 8>}, {pipeline_mode = #tpu.pipeline_mode<synchronous>, transform_indices = @transform_6, window_bounds = array<i64: 9, 8, 8>}, {pipeline_mode = #tpu.pipeline_mode<synchronous>, transform_indices = @transform_7, window_bounds = array<i64: 16, 8>}, {transform_indices = @transform_8, window_bounds = array<i64: 1, 8, 8, 8>}]} {
    %c0 = arith.constant 0 : index
    %c0_0 = arith.constant 0 : index
    %c0_1 = arith.constant 0 : index
    %c0_2 = arith.constant 0 : index
    %0 = vector.load %arg1[%c0, %c0_0, %c0_1, %c0_2] : memref<1x8x8x16xf32, #tpu.memory_space<vmem>>, vector<1x8x8x16xf32>
    %1 = vector.shape_cast %0 : vector<1x8x8x16xf32> to vector<8x8x16xf32>
    %c0_3 = arith.constant 0 : index
    %c0_4 = arith.constant 0 : index
    %2 = vector.load %arg2[%c0_3, %c0_4] : memref<1x16xf32, #tpu.memory_space<vmem>>, vector<1x16xf32>
    %3 = vector.shape_cast %2 : vector<1x16xf32> to vector<16xf32>
    %4 = vector.shape_cast %3 : vector<16xf32> to vector<1x1x16xf32>
    %5 = vector.broadcast %4 : vector<1x1x16xf32> to vector<8x8x16xf32>
    %6 = arith.mulf %1, %5 : vector<8x8x16xf32>
    %c0_5 = arith.constant 0 : index
    %c0_6 = arith.constant 0 : index
    %7 = vector.load %arg3[%c0_5, %c0_6] : memref<1x16xf32, #tpu.memory_space<vmem>>, vector<1x16xf32>
    %8 = vector.shape_cast %7 : vector<1x16xf32> to vector<16xf32>
    %9 = vector.shape_cast %8 : vector<16xf32> to vector<1x1x16xf32>
    %10 = vector.broadcast %9 : vector<1x1x16xf32> to vector<8x8x16xf32>
    %11 = arith.addf %6, %10 : vector<8x8x16xf32>
    %cst = arith.constant 0.000000e+00 : f32
    %12 = vector.broadcast %cst : f32 to vector<8x8x16xf32>
    %13 = arith.maximumf %11, %12 : vector<8x8x16xf32>
    %cst_7 = arith.constant 0.000000e+00 : f32
    %14 = vector.broadcast %cst_7 : f32 to vector<9x9x16xf32>
    %c0_8 = arith.constant 0 : index
    %c0_9 = arith.constant 0 : index
    %c0_10 = arith.constant 0 : index
    %15 = vector.load %arg10[%c0_8, %c0_9, %c0_10] : memref<9x9x16xf32, #tpu.memory_space<vmem>>, vector<9x9x16xf32>
    tpu.vector_store %arg10[%c0_8, %c0_9, %c0_10], %14 {strides = array<i32>} : memref<9x9x16xf32, #tpu.memory_space<vmem>>, vector<9x9x16xf32>,
    %c1 = arith.constant 1 : index
    %c1_11 = arith.constant 1 : index
    %c0_12 = arith.constant 0 : index
    %16 = vector.load %arg10[%c1, %c1_11, %c0_12] : memref<9x9x16xf32, #tpu.memory_space<vmem>>, vector<8x8x16xf32>
    tpu.vector_store %arg10[%c1, %c1_11, %c0_12], %13 {strides = array<i32>} : memref<9x9x16xf32, #tpu.memory_space<vmem>>, vector<8x8x16xf32>,
    %cst_13 = arith.constant 0.000000e+00 : f32
    %17 = vector.broadcast %cst_13 : f32 to vector<64x8xf32>
    %c0_14 = arith.constant 0 : index
    %c0_15 = arith.constant 0 : index
    %c0_16 = arith.constant 0 : index
    %18 = vector.load %arg10[%c0_14, %c0_15, %c0_16] : memref<9x9x16xf32, #tpu.memory_space<vmem>>, vector<8x8x16xf32>
    %19 = vector.shape_cast %18 : vector<8x8x16xf32> to vector<64x16xf32>
    %20 = arith.truncf %19 : vector<64x16xf32> to vector<64x16xbf16>
    %c0_17 = arith.constant 0 : index
    %c0_18 = arith.constant 0 : index
    %c0_19 = arith.constant 0 : index
    %21 = vector.load %arg4[%c0_17, %c0_18, %c0_19] : memref<4x16x8xbf16, #tpu.memory_space<vmem>>, vector<1x16x8xbf16>
    %22 = vector.shape_cast %21 : vector<1x16x8xbf16> to vector<16x8xbf16>
    %cst_20 = arith.constant dense<0.000000e+00> : vector<64x8xf32>
    %23 = tpu.matmul %20, %22, %cst_20 {dimension_numbers = #tpu.dot_dimension_numbers<[1], [0], [0], [1], [0, 0, 1, 1], [], []>} : vector<64x16xbf16>, vector<16x8xbf16>, vector<64x8xf32> -> vector<64x8xf32>
    %24 = arith.addf %17, %23 : vector<64x8xf32>
    %c0_21 = arith.constant 0 : index
    %c1_22 = arith.constant 1 : index
    %c0_23 = arith.constant 0 : index
    %25 = vector.load %arg10[%c0_21, %c1_22, %c0_23] : memref<9x9x16xf32, #tpu.memory_space<vmem>>, vector<8x8x16xf32>
    %26 = vector.shape_cast %25 : vector<8x8x16xf32> to vector<64x16xf32>
    %27 = arith.truncf %26 : vector<64x16xf32> to vector<64x16xbf16>
    %c1_24 = arith.constant 1 : index
    %c0_25 = arith.constant 0 : index
    %c0_26 = arith.constant 0 : index
    %28 = vector.load %arg4[%c1_24, %c0_25, %c0_26] : memref<4x16x8xbf16, #tpu.memory_space<vmem>>, vector<1x16x8xbf16>
    %29 = vector.shape_cast %28 : vector<1x16x8xbf16> to vector<16x8xbf16>
    %cst_27 = arith.constant dense<0.000000e+00> : vector<64x8xf32>
    %30 = tpu.matmul %27, %29, %cst_27 {dimension_numbers = #tpu.dot_dimension_numbers<[1], [0], [0], [1], [0, 0, 1, 1], [], []>} : vector<64x16xbf16>, vector<16x8xbf16>, vector<64x8xf32> -> vector<64x8xf32>
    %31 = arith.addf %24, %30 : vector<64x8xf32>
    %c1_28 = arith.constant 1 : index
    %c0_29 = arith.constant 0 : index
    %c0_30 = arith.constant 0 : index
    %32 = vector.load %arg10[%c1_28, %c0_29, %c0_30] : memref<9x9x16xf32, #tpu.memory_space<vmem>>, vector<8x8x16xf32>
    %33 = vector.shape_cast %32 : vector<8x8x16xf32> to vector<64x16xf32>
    %34 = arith.truncf %33 : vector<64x16xf32> to vector<64x16xbf16>
    %c2 = arith.constant 2 : index
    %c0_31 = arith.constant 0 : index
    %c0_32 = arith.constant 0 : index
    %35 = vector.load %arg4[%c2, %c0_31, %c0_32] : memref<4x16x8xbf16, #tpu.memory_space<vmem>>, vector<1x16x8xbf16>
    %36 = vector.shape_cast %35 : vector<1x16x8xbf16> to vector<16x8xbf16>
    %cst_33 = arith.constant dense<0.000000e+00> : vector<64x8xf32>
    %37 = tpu.matmul %34, %36, %cst_33 {dimension_numbers = #tpu.dot_dimension_numbers<[1], [0], [0], [1], [0, 0, 1, 1], [], []>} : vector<64x16xbf16>, vector<16x8xbf16>, vector<64x8xf32> -> vector<64x8xf32>
    %38 = arith.addf %31, %37 : vector<64x8xf32>
    %c1_34 = arith.constant 1 : index
    %c1_35 = arith.constant 1 : index
    %c0_36 = arith.constant 0 : index
    %39 = vector.load %arg10[%c1_34, %c1_35, %c0_36] : memref<9x9x16xf32, #tpu.memory_space<vmem>>, vector<8x8x16xf32>
    %40 = vector.shape_cast %39 : vector<8x8x16xf32> to vector<64x16xf32>
    %41 = arith.truncf %40 : vector<64x16xf32> to vector<64x16xbf16>
    %c3 = arith.constant 3 : index
    %c0_37 = arith.constant 0 : index
    %c0_38 = arith.constant 0 : index
    %42 = vector.load %arg4[%c3, %c0_37, %c0_38] : memref<4x16x8xbf16, #tpu.memory_space<vmem>>, vector<1x16x8xbf16>
    %43 = vector.shape_cast %42 : vector<1x16x8xbf16> to vector<16x8xbf16>
    %cst_39 = arith.constant dense<0.000000e+00> : vector<64x8xf32>
    %44 = tpu.matmul %41, %43, %cst_39 {dimension_numbers = #tpu.dot_dimension_numbers<[1], [0], [0], [1], [0, 0, 1, 1], [], []>} : vector<64x16xbf16>, vector<16x8xbf16>, vector<64x8xf32> -> vector<64x8xf32>
    %45 = arith.addf %38, %44 : vector<64x8xf32>
    %c0_40 = arith.constant 0 : index
    %c0_41 = arith.constant 0 : index
    %46 = vector.load %arg5[%c0_40, %c0_41] : memref<1x8xf32, #tpu.memory_space<vmem>>, vector<1x8xf32>
    %47 = vector.shape_cast %46 : vector<1x8xf32> to vector<8xf32>
    %48 = vector.shape_cast %47 : vector<8xf32> to vector<1x8xf32>
    %49 = vector.broadcast %48 : vector<1x8xf32> to vector<64x8xf32>
    %50 = arith.mulf %45, %49 : vector<64x8xf32>
    %c0_42 = arith.constant 0 : index
    %c0_43 = arith.constant 0 : index
    %51 = vector.load %arg6[%c0_42, %c0_43] : memref<1x8xf32, #tpu.memory_space<vmem>>, vector<1x8xf32>
    %52 = vector.shape_cast %51 : vector<1x8xf32> to vector<8xf32>
    %53 = vector.shape_cast %52 : vector<8xf32> to vector<1x8xf32>
    %54 = vector.broadcast %53 : vector<1x8xf32> to vector<64x8xf32>
    %55 = arith.addf %50, %54 : vector<64x8xf32>
    %cst_44 = arith.constant 0.000000e+00 : f32
    %56 = vector.broadcast %cst_44 : f32 to vector<64x8xf32>
    %57 = arith.maximumf %55, %56 : vector<64x8xf32>
    %cst_45 = arith.constant 0.000000e+00 : f32
    %58 = vector.broadcast %cst_45 : f32 to vector<10x10x8xf32>
    %c0_46 = arith.constant 0 : index
    %c0_47 = arith.constant 0 : index
    %c0_48 = arith.constant 0 : index
    %59 = vector.load %arg11[%c0_46, %c0_47, %c0_48] : memref<10x10x8xf32, #tpu.memory_space<vmem>>, vector<10x10x8xf32>
    tpu.vector_store %arg11[%c0_46, %c0_47, %c0_48], %58 {strides = array<i32>} : memref<10x10x8xf32, #tpu.memory_space<vmem>>, vector<10x10x8xf32>,
    %60 = vector.shape_cast %57 : vector<64x8xf32> to vector<8x8x8xf32>
    %c1_49 = arith.constant 1 : index
    %c1_50 = arith.constant 1 : index
    %c0_51 = arith.constant 0 : index
    %61 = vector.load %arg11[%c1_49, %c1_50, %c0_51] : memref<10x10x8xf32, #tpu.memory_space<vmem>>, vector<8x8x8xf32>
    tpu.vector_store %arg11[%c1_49, %c1_50, %c0_51], %60 {strides = array<i32>} : memref<10x10x8xf32, #tpu.memory_space<vmem>>, vector<8x8x8xf32>,
    %62 = vector.shape_cast %13 : vector<8x8x16xf32> to vector<64x16xf32>
    %63 = arith.truncf %62 : vector<64x16xf32> to vector<64x16xbf16>
    %c0_52 = arith.constant 0 : index
    %c0_53 = arith.constant 0 : index
    %64 = vector.load %arg8[%c0_52, %c0_53] : memref<16x8xbf16, #tpu.memory_space<vmem>>, vector<16x8xbf16>
    %cst_54 = arith.constant dense<0.000000e+00> : vector<64x8xf32>
    %65 = tpu.matmul %63, %64, %cst_54 {dimension_numbers = #tpu.dot_dimension_numbers<[1], [0], [0], [1], [0, 0, 1, 1], [], []>} : vector<64x16xbf16>, vector<16x8xbf16>, vector<64x8xf32> -> vector<64x8xf32>
    %c0_55 = arith.constant 0 : index
    %c0_56 = arith.constant 0 : index
    %c0_57 = arith.constant 0 : index
    %66 = vector.load %arg11[%c0_55, %c0_56, %c0_57] : memref<10x10x8xf32, #tpu.memory_space<vmem>>, vector<8x8x8xf32>
    %67 = vector.shape_cast %66 : vector<8x8x8xf32> to vector<64x8xf32>
    %68 = arith.truncf %67 : vector<64x8xf32> to vector<64x8xbf16>
    %c0_58 = arith.constant 0 : index
    %c0_59 = arith.constant 0 : index
    %c0_60 = arith.constant 0 : index
    %69 = vector.load %arg7[%c0_58, %c0_59, %c0_60] : memref<9x8x8xbf16, #tpu.memory_space<vmem>>, vector<1x8x8xbf16>
    %70 = vector.shape_cast %69 : vector<1x8x8xbf16> to vector<8x8xbf16>
    %cst_61 = arith.constant dense<0.000000e+00> : vector<64x8xf32>
    %71 = tpu.matmul %68, %70, %cst_61 {dimension_numbers = #tpu.dot_dimension_numbers<[1], [0], [0], [1], [0, 0, 1, 1], [], []>} : vector<64x8xbf16>, vector<8x8xbf16>, vector<64x8xf32> -> vector<64x8xf32>
    %72 = arith.addf %65, %71 : vector<64x8xf32>
    %c0_62 = arith.constant 0 : index
    %c1_63 = arith.constant 1 : index
    %c0_64 = arith.constant 0 : index
    %73 = vector.load %arg11[%c0_62, %c1_63, %c0_64] : memref<10x10x8xf32, #tpu.memory_space<vmem>>, vector<8x8x8xf32>
    %74 = vector.shape_cast %73 : vector<8x8x8xf32> to vector<64x8xf32>
    %75 = arith.truncf %74 : vector<64x8xf32> to vector<64x8xbf16>
    %c1_65 = arith.constant 1 : index
    %c0_66 = arith.constant 0 : index
    %c0_67 = arith.constant 0 : index
    %76 = vector.load %arg7[%c1_65, %c0_66, %c0_67] : memref<9x8x8xbf16, #tpu.memory_space<vmem>>, vector<1x8x8xbf16>
    %77 = vector.shape_cast %76 : vector<1x8x8xbf16> to vector<8x8xbf16>
    %cst_68 = arith.constant dense<0.000000e+00> : vector<64x8xf32>
    %78 = tpu.matmul %75, %77, %cst_68 {dimension_numbers = #tpu.dot_dimension_numbers<[1], [0], [0], [1], [0, 0, 1, 1], [], []>} : vector<64x8xbf16>, vector<8x8xbf16>, vector<64x8xf32> -> vector<64x8xf32>
    %79 = arith.addf %72, %78 : vector<64x8xf32>
    %c0_69 = arith.constant 0 : index
    %c2_70 = arith.constant 2 : index
    %c0_71 = arith.constant 0 : index
    %80 = vector.load %arg11[%c0_69, %c2_70, %c0_71] : memref<10x10x8xf32, #tpu.memory_space<vmem>>, vector<8x8x8xf32>
    %81 = vector.shape_cast %80 : vector<8x8x8xf32> to vector<64x8xf32>
    %82 = arith.truncf %81 : vector<64x8xf32> to vector<64x8xbf16>
    %c2_72 = arith.constant 2 : index
    %c0_73 = arith.constant 0 : index
    %c0_74 = arith.constant 0 : index
    %83 = vector.load %arg7[%c2_72, %c0_73, %c0_74] : memref<9x8x8xbf16, #tpu.memory_space<vmem>>, vector<1x8x8xbf16>
    %84 = vector.shape_cast %83 : vector<1x8x8xbf16> to vector<8x8xbf16>
    %cst_75 = arith.constant dense<0.000000e+00> : vector<64x8xf32>
    %85 = tpu.matmul %82, %84, %cst_75 {dimension_numbers = #tpu.dot_dimension_numbers<[1], [0], [0], [1], [0, 0, 1, 1], [], []>} : vector<64x8xbf16>, vector<8x8xbf16>, vector<64x8xf32> -> vector<64x8xf32>
    %86 = arith.addf %79, %85 : vector<64x8xf32>
    %c1_76 = arith.constant 1 : index
    %c0_77 = arith.constant 0 : index
    %c0_78 = arith.constant 0 : index
    %87 = vector.load %arg11[%c1_76, %c0_77, %c0_78] : memref<10x10x8xf32, #tpu.memory_space<vmem>>, vector<8x8x8xf32>
    %88 = vector.shape_cast %87 : vector<8x8x8xf32> to vector<64x8xf32>
    %89 = arith.truncf %88 : vector<64x8xf32> to vector<64x8xbf16>
    %c3_79 = arith.constant 3 : index
    %c0_80 = arith.constant 0 : index
    %c0_81 = arith.constant 0 : index
    %90 = vector.load %arg7[%c3_79, %c0_80, %c0_81] : memref<9x8x8xbf16, #tpu.memory_space<vmem>>, vector<1x8x8xbf16>
    %91 = vector.shape_cast %90 : vector<1x8x8xbf16> to vector<8x8xbf16>
    %cst_82 = arith.constant dense<0.000000e+00> : vector<64x8xf32>
    %92 = tpu.matmul %89, %91, %cst_82 {dimension_numbers = #tpu.dot_dimension_numbers<[1], [0], [0], [1], [0, 0, 1, 1], [], []>} : vector<64x8xbf16>, vector<8x8xbf16>, vector<64x8xf32> -> vector<64x8xf32>
    %93 = arith.addf %86, %92 : vector<64x8xf32>
    %c1_83 = arith.constant 1 : index
    %c1_84 = arith.constant 1 : index
    %c0_85 = arith.constant 0 : index
    %94 = vector.load %arg11[%c1_83, %c1_84, %c0_85] : memref<10x10x8xf32, #tpu.memory_space<vmem>>, vector<8x8x8xf32>
    %95 = vector.shape_cast %94 : vector<8x8x8xf32> to vector<64x8xf32>
    %96 = arith.truncf %95 : vector<64x8xf32> to vector<64x8xbf16>
    %c4 = arith.constant 4 : index
    %c0_86 = arith.constant 0 : index
    %c0_87 = arith.constant 0 : index
    %97 = vector.load %arg7[%c4, %c0_86, %c0_87] : memref<9x8x8xbf16, #tpu.memory_space<vmem>>, vector<1x8x8xbf16>
    %98 = vector.shape_cast %97 : vector<1x8x8xbf16> to vector<8x8xbf16>
    %cst_88 = arith.constant dense<0.000000e+00> : vector<64x8xf32>
    %99 = tpu.matmul %96, %98, %cst_88 {dimension_numbers = #tpu.dot_dimension_numbers<[1], [0], [0], [1], [0, 0, 1, 1], [], []>} : vector<64x8xbf16>, vector<8x8xbf16>, vector<64x8xf32> -> vector<64x8xf32>
    %100 = arith.addf %93, %99 : vector<64x8xf32>
    %c1_89 = arith.constant 1 : index
    %c2_90 = arith.constant 2 : index
    %c0_91 = arith.constant 0 : index
    %101 = vector.load %arg11[%c1_89, %c2_90, %c0_91] : memref<10x10x8xf32, #tpu.memory_space<vmem>>, vector<8x8x8xf32>
    %102 = vector.shape_cast %101 : vector<8x8x8xf32> to vector<64x8xf32>
    %103 = arith.truncf %102 : vector<64x8xf32> to vector<64x8xbf16>
    %c5 = arith.constant 5 : index
    %c0_92 = arith.constant 0 : index
    %c0_93 = arith.constant 0 : index
    %104 = vector.load %arg7[%c5, %c0_92, %c0_93] : memref<9x8x8xbf16, #tpu.memory_space<vmem>>, vector<1x8x8xbf16>
    %105 = vector.shape_cast %104 : vector<1x8x8xbf16> to vector<8x8xbf16>
    %cst_94 = arith.constant dense<0.000000e+00> : vector<64x8xf32>
    %106 = tpu.matmul %103, %105, %cst_94 {dimension_numbers = #tpu.dot_dimension_numbers<[1], [0], [0], [1], [0, 0, 1, 1], [], []>} : vector<64x8xbf16>, vector<8x8xbf16>, vector<64x8xf32> -> vector<64x8xf32>
    %107 = arith.addf %100, %106 : vector<64x8xf32>
    %c2_95 = arith.constant 2 : index
    %c0_96 = arith.constant 0 : index
    %c0_97 = arith.constant 0 : index
    %108 = vector.load %arg11[%c2_95, %c0_96, %c0_97] : memref<10x10x8xf32, #tpu.memory_space<vmem>>, vector<8x8x8xf32>
    %109 = vector.shape_cast %108 : vector<8x8x8xf32> to vector<64x8xf32>
    %110 = arith.truncf %109 : vector<64x8xf32> to vector<64x8xbf16>
    %c6 = arith.constant 6 : index
    %c0_98 = arith.constant 0 : index
    %c0_99 = arith.constant 0 : index
    %111 = vector.load %arg7[%c6, %c0_98, %c0_99] : memref<9x8x8xbf16, #tpu.memory_space<vmem>>, vector<1x8x8xbf16>
    %112 = vector.shape_cast %111 : vector<1x8x8xbf16> to vector<8x8xbf16>
    %cst_100 = arith.constant dense<0.000000e+00> : vector<64x8xf32>
    %113 = tpu.matmul %110, %112, %cst_100 {dimension_numbers = #tpu.dot_dimension_numbers<[1], [0], [0], [1], [0, 0, 1, 1], [], []>} : vector<64x8xbf16>, vector<8x8xbf16>, vector<64x8xf32> -> vector<64x8xf32>
    %114 = arith.addf %107, %113 : vector<64x8xf32>
    %c2_101 = arith.constant 2 : index
    %c1_102 = arith.constant 1 : index
    %c0_103 = arith.constant 0 : index
    %115 = vector.load %arg11[%c2_101, %c1_102, %c0_103] : memref<10x10x8xf32, #tpu.memory_space<vmem>>, vector<8x8x8xf32>
    %116 = vector.shape_cast %115 : vector<8x8x8xf32> to vector<64x8xf32>
    %117 = arith.truncf %116 : vector<64x8xf32> to vector<64x8xbf16>
    %c7 = arith.constant 7 : index
    %c0_104 = arith.constant 0 : index
    %c0_105 = arith.constant 0 : index
    %118 = vector.load %arg7[%c7, %c0_104, %c0_105] : memref<9x8x8xbf16, #tpu.memory_space<vmem>>, vector<1x8x8xbf16>
    %119 = vector.shape_cast %118 : vector<1x8x8xbf16> to vector<8x8xbf16>
    %cst_106 = arith.constant dense<0.000000e+00> : vector<64x8xf32>
    %120 = tpu.matmul %117, %119, %cst_106 {dimension_numbers = #tpu.dot_dimension_numbers<[1], [0], [0], [1], [0, 0, 1, 1], [], []>} : vector<64x8xbf16>, vector<8x8xbf16>, vector<64x8xf32> -> vector<64x8xf32>
    %121 = arith.addf %114, %120 : vector<64x8xf32>
    %c2_107 = arith.constant 2 : index
    %c2_108 = arith.constant 2 : index
    %c0_109 = arith.constant 0 : index
    %122 = vector.load %arg11[%c2_107, %c2_108, %c0_109] : memref<10x10x8xf32, #tpu.memory_space<vmem>>, vector<8x8x8xf32>
    %123 = vector.shape_cast %122 : vector<8x8x8xf32> to vector<64x8xf32>
    %124 = arith.truncf %123 : vector<64x8xf32> to vector<64x8xbf16>
    %c8 = arith.constant 8 : index
    %c0_110 = arith.constant 0 : index
    %c0_111 = arith.constant 0 : index
    %125 = vector.load %arg7[%c8, %c0_110, %c0_111] : memref<9x8x8xbf16, #tpu.memory_space<vmem>>, vector<1x8x8xbf16>
    %126 = vector.shape_cast %125 : vector<1x8x8xbf16> to vector<8x8xbf16>
    %cst_112 = arith.constant dense<0.000000e+00> : vector<64x8xf32>
    %127 = tpu.matmul %124, %126, %cst_112 {dimension_numbers = #tpu.dot_dimension_numbers<[1], [0], [0], [1], [0, 0, 1, 1], [], []>} : vector<64x8xbf16>, vector<8x8xbf16>, vector<64x8xf32> -> vector<64x8xf32>
    %128 = arith.addf %121, %127 : vector<64x8xf32>
    %129 = vector.shape_cast %128 : vector<64x8xf32> to vector<8x8x8xf32>
    %c0_113 = arith.constant 0 : index
    %c0_114 = arith.constant 0 : index
    %c0_115 = arith.constant 0 : index
    %c0_116 = arith.constant 0 : index
    %130 = vector.load %arg9[%c0_113, %c0_114, %c0_115, %c0_116] : memref<1x8x8x8xf32, #tpu.memory_space<vmem>>, vector<1x8x8x8xf32>
    %131 = vector.shape_cast %130 : vector<1x8x8x8xf32> to vector<8x8x8xf32>
    %132 = vector.shape_cast %129 : vector<8x8x8xf32> to vector<1x8x8x8xf32>
    tpu.vector_store %arg9[%c0_113, %c0_114, %c0_115, %c0_116], %132 {strides = array<i32>} : memref<1x8x8x8xf32, #tpu.memory_space<vmem>>, vector<1x8x8x8xf32>,
    return
  }
  func.func @transform_0(%arg0: i32) -> (i32, i32, i32, i32) {
    %c0_i32 = arith.constant 0 : i32
    %c0_i32_0 = arith.constant 0 : i32
    %c0_i32_1 = arith.constant 0 : i32
    %c0_i32_2 = arith.constant 0 : i32
    return %arg0, %c0_i32, %c0_i32_0, %c0_i32_1 : i32, i32, i32, i32
  }
  func.func @transform_1(%arg0: i32) -> (i32, i32) {
    %c0_i32 = arith.constant 0 : i32
    %c0_i32_0 = arith.constant 0 : i32
    %c0_i32_1 = arith.constant 0 : i32
    return %c0_i32, %c0_i32_0 : i32, i32
  }
  func.func @transform_2(%arg0: i32) -> (i32, i32) {
    %c0_i32 = arith.constant 0 : i32
    %c0_i32_0 = arith.constant 0 : i32
    %c0_i32_1 = arith.constant 0 : i32
    return %c0_i32, %c0_i32_0 : i32, i32
  }
  func.func @transform_3(%arg0: i32) -> (i32, i32, i32) {
    %c0_i32 = arith.constant 0 : i32
    %c0_i32_0 = arith.constant 0 : i32
    %c0_i32_1 = arith.constant 0 : i32
    %c0_i32_2 = arith.constant 0 : i32
    return %c0_i32, %c0_i32_0, %c0_i32_1 : i32, i32, i32
  }
  func.func @transform_4(%arg0: i32) -> (i32, i32) {
    %c0_i32 = arith.constant 0 : i32
    %c0_i32_0 = arith.constant 0 : i32
    %c0_i32_1 = arith.constant 0 : i32
    return %c0_i32, %c0_i32_0 : i32, i32
  }
  func.func @transform_5(%arg0: i32) -> (i32, i32) {
    %c0_i32 = arith.constant 0 : i32
    %c0_i32_0 = arith.constant 0 : i32
    %c0_i32_1 = arith.constant 0 : i32
    return %c0_i32, %c0_i32_0 : i32, i32
  }
  func.func @transform_6(%arg0: i32) -> (i32, i32, i32) {
    %c0_i32 = arith.constant 0 : i32
    %c0_i32_0 = arith.constant 0 : i32
    %c0_i32_1 = arith.constant 0 : i32
    %c0_i32_2 = arith.constant 0 : i32
    return %c0_i32, %c0_i32_0, %c0_i32_1 : i32, i32, i32
  }
  func.func @transform_7(%arg0: i32) -> (i32, i32) {
    %c0_i32 = arith.constant 0 : i32
    %c0_i32_0 = arith.constant 0 : i32
    %c0_i32_1 = arith.constant 0 : i32
    return %c0_i32, %c0_i32_0 : i32, i32
  }
  func.func @transform_8(%arg0: i32) -> (i32, i32, i32, i32) {
    %c0_i32 = arith.constant 0 : i32
    %c0_i32_0 = arith.constant 0 : i32
    %c0_i32_1 = arith.constant 0 : i32
    %c0_i32_2 = arith.constant 0 : i32
    return %arg0, %c0_i32, %c0_i32_0, %c0_i32_1 : i32, i32, i32, i32
  }
}

</mosaic_0001>

<bundles_post_ra>
// kernel: res_block_forward.1
= control target key start
LH: loop header
LB: loop body
LE: loop exit
PB: predicated region body
PF: predicated region fallthrough
CT: control target
= control target key end

     0   :  { %s1582_s27 = smov 0   ;;  %s2075_s0 = inlined_call_operand.vmem [shape: f32[2,8,8,16], index: 0, kind: input, shape index: {}]   ;;  %s2076_s1 = inlined_call_operand.vmem [shape: f32[1,16], index: 1, kind: input, shape index: {}]   ;;  %s2077_s2 = inlined_call_operand.vmem [shape: f32[1,16], index: 2, kind: input, shape index: {}]   ;;  %s2078_s3 = inlined_call_operand.vmem [shape: bf16[4,16,8], index: 3, kind: input, shape index: {}]   ;;  %s2079_s4 = inlined_call_operand.vmem [shape: f32[1,8], index: 4, kind: input, shape index: {}]   ;;  %s2080_s5 = inlined_call_operand.vmem [shape: f32[1,8], index: 5, kind: input, shape index: {}]   ;;  %s2081_s6 = inlined_call_operand.vmem [shape: bf16[9,8,8], index: 6, kind: input, shape index: {}]   ;;  %s2082_s7 = inlined_call_operand.vmem [shape: bf16[16,8], index: 7, kind: input, shape index: {}]   ;;  %s2083_s8 = inlined_call_operand.vmem [shape: f32[2,8,8,8], index: 8, kind: output, shape index: {}]  }
   0x1 LB: > { %s1405_s28 = sadd.s32 4294967295, %s1534_s27   ;;  %p1409_p0 = scmp.ge.s32.totalorder %s1534_s27, 1  ;;  %s1534_s27 = sphi %s1582_s27, %s18_s27  }
   0x2   : > { %p262_p1 = scmp.lt.s32.totalorder %s1534_s27, 3 }
   0x4   : > { %p263_p2 = pnand %p1409_p0, %p262_p1 }
   0x5   : > { %p296_p3 = scmp.lt.s32.totalorder (!%p263_p2), %s1405_s28, 1 }
   0x6   : > { %266 = sbr.rel (%p263_p2) target bundleno = 533 (0x215), region = 52 }
   0xb   : > { %v1509_v0 = vld [vmem:[%s2078_s3 + $0x8] sm:$0xff]  ;;  %v1508_v1 = vld [vmem:[%s2078_s3] sm:$0xff]  ;;  %vm347_vm0 = vcmask 130048   ;;  %s2085_s28 = smov (!%p296_p3, %s1405_s28), 1  ;;  %vm349_vm1 = vcmask 122880   ;;  %v1510_v3 = vld [vmem:[%s2078_s3 + $0x10] sm:$0xff] }
   0xc   : > { %v1599_v2 = vld [vmem:[%s2076_s1] ss:$0 sm:$0xff]  ;;  %1513 = vmatpush.bf16.msra.mxu2 %v1509_v0  ;;  %1514 = vmatpush.bf16.msra.mxu3 %v1508_v1  ;;  %v1511_v4 = vld [vmem:[%s2078_s3 + $0x18] sm:$0xff]  ;;  %v1536_v5 = vmov 0.0   ;;  %s1506_s17 = sshll.u32 %s2085_s28, 6  ;;  %vm733_vm2 = vcmask 1043456  }
   0xd   : > { %357 = vst.msk [vmem:[#allocation2 + $0x40] sm:$0xff] %vm347_vm0, %v1536_v5  ;;  %430 = vmatpush.bf16.msra.mxu0 %v1509_v0  ;;  %477 = vmatpush.bf16.msra.mxu1 %v1508_v1  ;;  %s1619_s20 = scalar_lea.vmem %s2075_s0, %s1506_s17  ;;  %v1624_v6 = vld [vmem:[%s2077_s2] ss:$0 sm:$0xff]  ;;  %vm671_vm3 = vcmask 64512   ;;  %vm673_vm4 = vcmask 58368   ;;  %s2029_s10 = scalar_lea.vmem %s2083_s8, %s1506_s17 }
   0xe   : > { %358 = vst.msk [vmem:[#allocation2 + $0x48] sm:$0x1] %vm349_vm1, %v1536_v5  ;;  %v310_v7 = vld [vmem:[%s1619_s20 + $0x18] sm:$0xff]  ;;  %v311_v8 = vld [vmem:[%s1619_s20 + $0x20] sm:$0xff]  ;;  %v312_v11 = vld [vmem:[%s1619_s20 + $0x28] sm:$0xff] }
   0xf   : > { %359 = vst.msk [vmem:[#allocation2 + $0x50] sm:$0xff] %vm347_vm0, %v1536_v5  ;;  %v322_v9 = vmul.f32 %v1599_v2, %v310_v7  ;;  %v323_v10 = vmul.f32 %v1599_v2, %v311_v8  ;;  %v313_v14 = vld [vmem:[%s1619_s20 + $0x30] sm:$0xff]  ;;  %v307_v15 = vld [vmem:[%s1619_s20] sm:$0xff]  ;;  %v324_v18 = vmul.f32 %v1599_v2, %v312_v11  ;;  %v308_v19 = vld [vmem:[%s1619_s20 + $0x8] sm:$0xff] }
  0x10   : > { %539 = vmatpush.bf16.msrb.mxu2 %v1510_v3  ;;  %609 = vmatpush.bf16.msrb.mxu3 %v1511_v4  ;;  %360 = vst.msk [vmem:[#allocation2 + $0x58] sm:$0x1] %vm349_vm1, %v1536_v5  ;;  %v325_v20 = vmul.f32 %v1599_v2, %v313_v14  ;;  %v319_v21 = vmul.f32 %v1599_v2, %v307_v15  ;;  %v309_v28 = vld [vmem:[%s1619_s20 + $0x10] sm:$0xff]  ;;  %v314_v61 = vld [vmem:[%s1619_s20 + $0x38] sm:$0xff]  ;;  %v1512_v4 = vld [vmem:[%s2082_s7] sm:$0xff] }
  0x11   : > { %348 = vst.msk [vmem:[#allocation2] sm:$0xff] %vm347_vm0, %v1536_v5  ;;  %v1640_v12 = vadd.f32 %v1624_v6, %v322_v9  ;;  %v1643_v13 = vadd.f32 %v1624_v6, %v323_v10  ;;  %v320_v22 = vmul.f32 %v1599_v2, %v308_v19  ;;  %v1671_v23 = vadd.f32 %v1624_v6, %v324_v18  ;;  %v720_v15 = vld [vmem:[%s2081_s6] sm:$0xf] }
  0x12   : > { %350 = vst.msk [vmem:[#allocation2 + $0x8] sm:$0x1] %vm349_vm1, %v1536_v5  ;;  %v1676_v24 = vadd.f32 %v1624_v6, %v325_v20  ;;  %v1681_v25 = vadd.f32 %v1624_v6, %v319_v21  ;;  %v321_v32 = vmul.f32 %v1599_v2, %v309_v28  ;;  %v326_v62 = vmul.f32 %v1599_v2, %v314_v61 }
  0x13   : > { %351 = vst.msk [vmem:[#allocation2 + $0x10] sm:$0xff] %vm347_vm0, %v1536_v5  ;;  %v342_v16 = vmax.f32 %v1640_v12, 0.0  ;;  %v343_v17 = vmax.f32 %v1643_v13, 0.0  ;;  %v1686_v26 = vadd.f32 %v1624_v6, %v320_v22  ;;  %v344_v27 = vmax.f32 %v1671_v23, 0.0  ;;  %791 = vmatpush.bf16.msrb.mxu1 %v1512_v4  ;;  %v1464_v23 = vld [vmem:[%s2081_s6 + $0x4] sm:$0xf] }
  0x14   : > { %352 = vst.msk [vmem:[#allocation2 + $0x18] sm:$0x1] %vm349_vm1, %v1536_v5  ;;  %v345_v31 = vmax.f32 %v1676_v24, 0.0  ;;  %v339_v35 = vmax.f32 %v1681_v25, 0.0  ;;  %v333_v39 = vadd.f32 %v1624_v6, %v321_v32  ;;  %v338_v63 = vadd.f32 %v1624_v6, %v326_v62  ;;  %v1469_v24 = vld [vmem:[%s2081_s6 + $0x8] sm:$0xf] }
  0x15   : > { %353 = vst.msk [vmem:[#allocation2 + $0x20] sm:$0xff] %vm347_vm0, %v1536_v5  ;;  %v340_v38 = vmax.f32 %v1686_v26, 0.0  ;;  %v735_v18 = vsel %vm733_vm2, %v720_v15, 0  ;;  %v704_v19 = vpack.c.bf16 %v344_v27, %v343_v17  ;;  %v840_v25 = vsel %vm733_vm2, %v1464_v23, 0 }
  0x16   : > { %354 = vst.msk [vmem:[#allocation2 + $0x28] sm:$0x1] %vm349_vm1, %v1536_v5  ;;  %v341_v40 = vmax.f32 %v333_v39, 0.0  ;;  %v346_v0 = vmax.f32 %v338_v63, 0.0  ;;  %744 = vmatpush.bf16.msrb.mxu0 %v735_v18  ;;  %v906_v26 = vsel %vm733_vm2, %v1469_v24, 0 }
  0x17   : > { %371 = vst.msk [vmem:[#allocation2 + $0x41] sm:$0xff] %vm347_vm0, %v342_v16  ;;  %v702_v7 = vpack.c.bf16 %v340_v38, %v339_v35 }
  0x18   : > { %372 = vst.msk [vmem:[#allocation2 + $0x51] sm:$0xff] %vm347_vm0, %v343_v17  ;;  %v376_v42 = vld [vmem:[#allocation2] sm:$0xff]  ;;  %v703_v14 = vpack.c.bf16 %v342_v16, %v341_v40  ;;  %v705_v13 = vpack.c.bf16 %v346_v0, %v345_v31 }
  0x19   : > { %355 = vst.msk [vmem:[#allocation2 + $0x30] sm:$0xff] %vm347_vm0, %v1536_v5  ;;  %v390_v41 = vld [vmem:[#allocation2 + $0x1] sm:$0xff] }
  0x1a   : > { %356 = vst.msk [vmem:[#allocation2 + $0x38] sm:$0x1] %vm349_vm1, %v1536_v5 }
  0x1b   : > { %361 = vst.msk [vmem:[#allocation2 + $0x60] sm:$0xff] %vm347_vm0, %v1536_v5 }
  0x1c   : > { %362 = vst.msk [vmem:[#allocation2 + $0x68] sm:$0x1] %vm349_vm1, %v1536_v5 }
  0x1d   : > { %363 = vst.msk [vmem:[#allocation2 + $0x70] sm:$0xff] %vm347_vm0, %v1536_v5 }
  0x1e   : > { %v394_v29 = vld [vmem:[#allocation2 + $0x41] sm:$0xff]  ;;  %364 = vst.msk [vmem:[#allocation2 + $0x78] sm:$0x1] %vm349_vm1, %v1536_v5 }
  0x1f   : > { %v380_v30 = vld [vmem:[#allocation2 + $0x40] sm:$0xff]  ;;  %v395_v33 = vld [vmem:[#allocation2 + $0x51] sm:$0xff]  ;;  %365 = vst.msk [vmem:[#allocation2 + $0x80] sm:$0xff] %vm347_vm0, %v1536_v5 }
  0x20   : > { %v381_v34 = vld [vmem:[#allocation2 + $0x50] sm:$0xff]  ;;  %v400_v36 = vpack.c.bf16 %v395_v33, %v394_v29  ;;  %366 = vst.msk [vmem:[#allocation2 + $0x88] sm:$0x1] %vm349_vm1, %v1536_v5 }
  0x21   : > { %v386_v37 = vpack.c.bf16 %v381_v34, %v380_v30  ;;  %373 = vst.msk [vmem:[#allocation2 + $0x61] sm:$0xff] %vm347_vm0, %v344_v27 }
  0x22   : > { %1422 = vmatmul.msk.bf16.vlgmr.msra.gmra.mxu2 %vm347_vm0, %v400_v36  ;;  %374 = vst.msk [vmem:[#allocation2 + $0x71] sm:$0xff] %vm347_vm0, %v345_v31  ;;  %v1479_v31 = vld [vmem:[%s2081_s6 + $0x10] sm:$0xf] }
  0x23   : > { %1430 = vmatmul.msk.bf16.vlgmr.msra.gmra.mxu3 %vm347_vm0, %v386_v37  ;;  %368 = vst.msk [vmem:[#allocation2 + $0x11] sm:$0xff] %vm347_vm0, %v339_v35  ;;  %849 = vmatpush.bf16.msra.mxu2 %v840_v25  ;;  %v1038_v32 = vsel %vm733_vm2, %v1479_v31, 0 }
  0x24   : > { %369 = vst.msk [vmem:[#allocation2 + $0x21] sm:$0xff] %vm347_vm0, %v340_v38  ;;  %915 = vmatpush.bf16.msra.mxu3 %v906_v26 }
  0x25   : > { %370 = vst.msk [vmem:[#allocation2 + $0x31] sm:$0xff] %vm347_vm0, %v341_v40 }
  0x26   : > { %375 = vst.msk [vmem:[#allocation2 + $0x81] sm:$0xff] %vm347_vm0, %v346_v0 }
  0x27   : > { %675 = vst.msk [vmem:[#allocation3 + $0x10] sm:$0xff] %vm671_vm3, %v1536_v5 }
  0x28   : > { %v396_v43 = vld [vmem:[#allocation2 + $0x61] sm:$0xff]  ;;  %676 = vst.msk [vmem:[#allocation3 + $0x18] sm:$0x3] %vm673_vm4, %v1536_v5 }
  0x29   : > { %v397_v46 = vld [vmem:[#allocation2 + $0x71] sm:$0xff]  ;;  %v382_v47 = vld [vmem:[#allocation2 + $0x60] sm:$0xff]  ;;  %v579_v8 = vpack.c.bf16 %v396_v43, %v395_v33  ;;  %672 = vst.msk [vmem:[#allocation3] sm:$0xff] %vm671_vm3, %v1536_v5  ;;  %v1474_v33 = vld [vmem:[%s2081_s6 + $0xc] sm:$0xf] }
  0x2a   : > { %v391_v44 = vld [vmem:[#allocation2 + $0x11] sm:$0xff]  ;;  %v401_v51 = vpack.c.bf16 %v397_v46, %v396_v43  ;;  %v509_v2 = vpack.c.bf16 %v382_v47, %v381_v34  ;;  %674 = vst.msk [vmem:[#allocation3 + $0x8] sm:$0x3] %vm673_vm4, %v1536_v5  ;;  %v972_v34 = vsel %vm733_vm2, %v1474_v33, 0  ;;  %v1831_v43 = vld [vmem:[%s2080_s5] ss:$0 sm:$0xff] }
  0x2b   : > { %v377_v45 = vld [vmem:[#allocation2 + $0x10] sm:$0xff]  ;;  %v398_v49 = vpack.c.bf16 %v391_v44, %v390_v41  ;;  %v500_v55 = vld [vmem:[#allocation2 + $0x20] sm:$0xff]  ;;  %677 = vst.msk [vmem:[#allocation3 + $0x20] sm:$0xff] %vm671_vm3, %v1536_v5 }
  0x2c   : > { %v383_v48 = vld [vmem:[#allocation2 + $0x70] sm:$0xff]  ;;  %v384_v50 = vpack.c.bf16 %v377_v45, %v376_v42  ;;  %v570_v56 = vld [vmem:[#allocation2 + $0x21] sm:$0xff]  ;;  %v507_v59 = vpack.c.bf16 %v500_v55, %v377_v45  ;;  %678 = vst.msk [vmem:[#allocation3 + $0x28] sm:$0x3] %vm673_vm4, %v1536_v5  ;;  %v1826_v41 = vld [vmem:[%s2079_s4] ss:$0 sm:$0xff] }
  0x2d   : > { %1420 = vmatmul.msk.bf16.vlgmr.msra.gmra.mxu0 %vm347_vm0, %v398_v49  ;;  %v387_v52 = vpack.c.bf16 %v383_v48, %v382_v47  ;;  %v393_v53 = vld [vmem:[#allocation2 + $0x31] sm:$0xff]  ;;  %v577_v60 = vpack.c.bf16 %v570_v56, %v391_v44  ;;  %v506_v6 = vld [vmem:[#allocation2 + $0x80] sm:$0xff]  ;;  %679 = vst.msk [vmem:[#allocation3 + $0x30] sm:$0xff] %vm671_vm3, %v1536_v5 }
  0x2e   : > { %1428 = vmatmul.msk.bf16.vlgmr.msra.gmra.mxu1 %vm347_vm0, %v384_v50  ;;  %v379_v54 = vld [vmem:[#allocation2 + $0x30] sm:$0xff]  ;;  %v399_v57 = vpack.c.bf16 %v393_v53, %v570_v56  ;;  %v578_v3 = vpack.c.bf16 %v394_v29, %v393_v53  ;;  %v576_v9 = vld [vmem:[#allocation2 + $0x81] sm:$0xff]  ;;  %v510_v10 = vpack.c.bf16 %v506_v6, %v383_v48  ;;  %680 = vst.msk [vmem:[#allocation3 + $0x38] sm:$0x3] %vm673_vm4, %v1536_v5 }
  0x2f   : > { %v385_v58 = vpack.c.bf16 %v379_v54, %v500_v55  ;;  %v508_v1 = vpack.c.bf16 %v380_v30, %v379_v54  ;;  %v580_v11 = vpack.c.bf16 %v576_v9, %v397_v46  ;;  %681 = vst.msk [vmem:[#allocation3 + $0x40] sm:$0xff] %vm671_vm3, %v1536_v5  ;;  %1047 = vmatpush.bf16.msra.mxu1 %v1038_v32 }
  0x30   : > { %682 = vst.msk [vmem:[#allocation3 + $0x48] sm:$0x3] %vm673_vm4, %v1536_v5  ;;  %981 = vmatpush.bf16.msra.mxu0 %v972_v34 }
  0x31   : > { %683 = vst.msk [vmem:[#allocation3 + $0x50] sm:$0xff] %vm671_vm3, %v1536_v5 }
  0x32   : > { %1423 = vmatmul.msk.bf16.gmra.mxu2 %vm347_vm0, %v401_v51  ;;  %684 = vst.msk [vmem:[#allocation3 + $0x58] sm:$0x3] %vm673_vm4, %v1536_v5 }
  0x33   : > { %1431 = vmatmul.msk.bf16.gmra.mxu3 %vm347_vm0, %v387_v52  ;;  %685 = vst.msk [vmem:[#allocation3 + $0x60] sm:$0xff] %vm671_vm3, %v1536_v5 }
  0x34   : > { %686 = vst.msk [vmem:[#allocation3 + $0x68] sm:$0x3] %vm673_vm4, %v1536_v5 }
  0x35   : > { %687 = vst.msk [vmem:[#allocation3 + $0x70] sm:$0xff] %vm671_vm3, %v1536_v5 }
  0x36   : > { %688 = vst.msk [vmem:[#allocation3 + $0x78] sm:$0x3] %vm673_vm4, %v1536_v5 }
  0x37   : > { %689 = vst.msk [vmem:[#allocation3 + $0x80] sm:$0xff] %vm671_vm3, %v1536_v5 }
  0x38   : > { %690 = vst.msk [vmem:[#allocation3 + $0x88] sm:$0x3] %vm673_vm4, %v1536_v5 }
  0x39   : > { %691 = vst.msk [vmem:[#allocation3 + $0x90] sm:$0xff] %vm671_vm3, %v1536_v5 }
  0x3a   : > { %692 = vst.msk [vmem:[#allocation3 + $0x98] sm:$0x3] %vm673_vm4, %v1536_v5 }
  0x3d   : > { %1421 = vmatmul.msk.bf16.gmra.mxu0 %vm347_vm0, %v399_v57 }
  0x3e   : > { %1429 = vmatmul.msk.bf16.gmra.mxu1 %vm347_vm0, %v385_v58  ;;  %v708_v58 = vld [vmem:[#allocation3] sm:$0xff] }
  0x42   : > { %1438 = vmatmul.msk.bf16.vlgmr.msrb.gmra.mxu2 %vm347_vm0, %v507_v59  ;;  %v813_v59 = vld [vmem:[#allocation3 + $0x1] sm:$0xff] }
  0x43   : > { %1448 = vmatmul.msk.bf16.vlgmr.msrb.gmra.mxu3 %vm347_vm0, %v577_v60  ;;  %v879_v60 = vld [vmem:[#allocation3 + $0x2] sm:$0xff] }
  0x4e   : > { %1460 = vmatmul.msk.bf16.vlgmr.msrb.gmra.mxu1 %vm347_vm0, %v702_v7 }
  0x52   : > { %1439 = vmatmul.msk.bf16.gmra.mxu2 %vm347_vm0, %v508_v1 }
  0x53   : > { %1449 = vmatmul.msk.bf16.gmra.mxu3 %vm347_vm0, %v578_v3 }
  0x5e   : > { %1461 = vmatmul.msk.bf16.gmra.mxu1 %vm347_vm0, %v703_v14 }
  0x62   : > { %1440 = vmatmul.msk.bf16.gmra.mxu2 %vm347_vm0, %v509_v2 }
  0x63   : > { %1450 = vmatmul.msk.bf16.gmra.mxu3 %vm347_vm0, %v579_v8 }
  0x6e   : > { %1462 = vmatmul.msk.bf16.gmra.mxu1 %vm347_vm0, %v704_v19 }
  0x72   : > { %1441 = vmatmul.msk.bf16.gmra.mxu2 %vm347_vm0, %v510_v10 }
  0x73   : > { %1451 = vmatmul.msk.bf16.gmra.mxu3 %vm347_vm0, %v580_v11 }
  0x7e   : > { %1463 = vmatmul.msk.bf16.gmra.mxu1 %vm347_vm0, %v705_v13 }
  0xa5   : > { %v1748_v20 = vpop.f32.mrf.mxu2 }
  0xa6   : > { %v1750_v12 = vpop.f32.mrf.mxu3 }
  0xa7   : > { %v490_v26 = vadd.f32 %v1750_v12, %v1748_v20 }
  0xaa   : > { %v432_v27 = vpop.f32.mrf.mxu0 }
  0xab   : > { %v479_v28 = vpop.f32.mrf.mxu1 }
  0xac   : > { %v480_v35 = vadd.f32 %v479_v28, %v432_v27 }
  0xad   : > { %v1752_v16 = vpop.f32.mrf.mxu2 }
  0xae   : > { %v1754_v21 = vpop.f32.mrf.mxu3 }
  0xb2   : > { %v434_v36 = vpop.f32.mrf.mxu0 }
  0xb3   : > { %v481_v37 = vpop.f32.mrf.mxu1 }
  0xb4   : > { %v482_v5 = vadd.f32 %v481_v37, %v434_v36 }
  0xb5   : > { %v1771_v17 = vpop.f32.mrf.mxu2 }
  0xb6   : > { %v1773_v22 = vpop.f32.mrf.mxu3 }
  0xba   : > { %v437_v50 = vpop.f32.mrf.mxu0 }
  0xbb   : > { %v484_v51 = vpop.f32.mrf.mxu1 }
  0xbc   : > { %v485_v53 = vadd.f32 %v484_v51, %v437_v50 }
  0xbd   : > { %v1799_v29 = vpop.f32.mrf.mxu2 }
  0xbe   : > { %v1801_v30 = vpop.f32.mrf.mxu3 }
  0xc2   : > { %v439_v8 = vpop.f32.mrf.mxu0 }
  0xc3   : > { %v486_v6 = vpop.f32.mrf.mxu1 }
  0xc4   : > { %v487_v10 = vadd.f32 %v486_v6, %v439_v8  ;;  %v1494_v6 = vld [vmem:[%s2081_s6 + $0x1c] sm:$0xf] }
  0xc5   : > { %v541_v38 = vpop.f32.mrf.mxu2 }
  0xc6   : > { %v611_v39 = vpop.f32.mrf.mxu3  ;;  %v561_v40 = vadd.f32 %v541_v38, %v480_v35 }
  0xc8   : > { %v631_v42 = vadd.f32 %v611_v39, %v561_v40 }
  0xca   : > { %v643_v44 = vmul.f32 %v1826_v41, %v631_v42 }
  0xcc   : > { %v655_v45 = vadd.f32 %v1831_v43, %v643_v44  ;;  %v1484_v44 = vld [vmem:[%s2081_s6 + $0x14] sm:$0xf] }
  0xcd   : > { %v543_v46 = vpop.f32.mrf.mxu2 }
  0xce   : > { %v613_v47 = vpop.f32.mrf.mxu3  ;;  %v663_v48 = vmax.f32 %v655_v45, 0.0  ;;  %v562_v49 = vadd.f32 %v543_v46, %v482_v5  ;;  %v492_v5 = vadd.f32 %v1754_v21, %v1752_v16  ;;  %v1104_v46 = vsel %vm733_vm2, %v1484_v44, 0  ;;  %v1489_v16 = vld [vmem:[%s2081_s6 + $0x18] sm:$0xf] }
  0xcf   : > { %1113 = vmatpush.bf16.msrb.mxu2 %v1104_v46  ;;  %v1171_v21 = vsel %vm733_vm2, %v1489_v16, 0 }
  0xd0   : > { %694 = vst.msk [vmem:[#allocation3 + $0x11] sm:$0xff] %vm671_vm3, %v663_v48  ;;  %v632_v52 = vadd.f32 %v613_v47, %v562_v49  ;;  %1180 = vmatpush.bf16.msrb.mxu3 %v1171_v21 }
  0xd2   : > { %v644_v54 = vmul.f32 %v1826_v41, %v632_v52 }
  0xd4   : > { %v656_v55 = vadd.f32 %v1831_v43, %v644_v54 }
  0xd5   : > { %v546_v56 = vpop.f32.mrf.mxu2 }
  0xd6   : > { %v616_v57 = vpop.f32.mrf.mxu3  ;;  %v664_v61 = vmax.f32 %v656_v55, 0.0  ;;  %v563_v62 = vadd.f32 %v546_v56, %v485_v53  ;;  %v495_v55 = vadd.f32 %v1773_v22, %v1771_v17 }
  0xd7   : > { %v1838_v63 = vld [vmem:[#allocation3 + $0x10] sm:$0xff] }
  0xd8   : > { %v814_v0 = vld [vmem:[#allocation3 + $0x11] sm:$0xff]  ;;  %695 = vst.msk [vmem:[#allocation3 + $0x21] sm:$0xff] %vm671_vm3, %v664_v61  ;;  %v633_v3 = vadd.f32 %v616_v57, %v563_v62  ;;  %v716_v4 = vpack.c.bf16 %v1838_v63, %v708_v58 }
  0xd9   : > { %v1840_v1 = vld [vmem:[#allocation3 + $0x12] sm:$0xff]  ;;  %v821_v7 = vpack.c.bf16 %v814_v0, %v813_v59 }
  0xda   : > { %v887_v2 = vpack.c.bf16 %v1840_v1, %v879_v60  ;;  %v645_v9 = vmul.f32 %v1826_v41, %v633_v3  ;;  %1452 = vmatmul.msk.bf16.vlgmr.msrb.gmra.mxu0 %vm671_vm3, %v716_v4 }
  0xdb   : > { %1465 = vmatmul.msk.bf16.vlgmr.msra.gmra.mxu2 %vm671_vm3, %v821_v7 }
  0xdc   : > { %1470 = vmatmul.msk.bf16.vlgmr.msra.gmra.mxu3 %vm671_vm3, %v887_v2  ;;  %v657_v11 = vadd.f32 %v1831_v43, %v645_v9  ;;  %v1499_v9 = vld [vmem:[%s2081_s6 + $0x20] sm:$0xf] }
  0xdd   : > { %v548_v14 = vpop.f32.mrf.mxu2 }
  0xde   : > { %v618_v15 = vpop.f32.mrf.mxu3  ;;  %v665_v18 = vmax.f32 %v657_v11, 0.0  ;;  %v564_v19 = vadd.f32 %v548_v14, %v487_v10  ;;  %v497_v10 = vadd.f32 %v1801_v30, %v1799_v29  ;;  %v1237_v14 = vsel %vm733_vm2, %v1494_v6, 0 }
  0xdf   : > { %v1012_v13 = vld [vmem:[#allocation3 + $0x21] sm:$0xff]  ;;  %1246 = vmatpush.bf16.msrb.mxu0 %v1237_v14 }
  0xe0   : > { %696 = vst.msk [vmem:[#allocation3 + $0x31] sm:$0xff] %vm671_vm3, %v665_v18  ;;  %v634_v23 = vadd.f32 %v618_v15, %v564_v19  ;;  %v1019_v24 = vpack.c.bf16 %v1012_v13, %v814_v0  ;;  %v1856_v34 = vld [vmem:[#allocation3 + $0x20] sm:$0xff]  ;;  %v1303_v15 = vsel %vm733_vm2, %v1499_v9, 0 }
  0xe1   : > { %v1858_v35 = vld [vmem:[#allocation3 + $0x22] sm:$0xff]  ;;  %1312 = vmatpush.bf16.msrb.mxu1 %v1303_v15 }
  0xe2   : > { %v646_v25 = vmul.f32 %v1826_v41, %v634_v23  ;;  %1480 = vmatmul.msk.bf16.vlgmr.msra.gmra.mxu1 %vm671_vm3, %v1019_v24 }
  0xe4   : > { %v658_v27 = vadd.f32 %v1831_v43, %v646_v25 }
  0xe5   : > { %v551_v28 = vpop.f32.mrf.mxu2 }
  0xe6   : > { %v621_v31 = vpop.f32.mrf.mxu3  ;;  %v666_v32 = vmax.f32 %v658_v27, 0.0  ;;  %v565_v33 = vadd.f32 %v551_v28, %v490_v26 }
  0xe7   : > { %v1860_v36 = vld [vmem:[#allocation3 + $0x30] sm:$0xff] }
  0xe8   : > { %v816_v37 = vld [vmem:[#allocation3 + $0x31] sm:$0xff]  ;;  %697 = vst.msk [vmem:[#allocation3 + $0x41] sm:$0xff] %vm671_vm3, %v666_v32  ;;  %v635_v39 = vadd.f32 %v621_v31, %v565_v33  ;;  %v1867_v20 = vpack.c.bf16 %v1860_v36, %v1856_v34 }
  0xe9   : > { %v1862_v38 = vld [vmem:[#allocation3 + $0x32] sm:$0xff]  ;;  %v1869_v12 = vpack.c.bf16 %v816_v37, %v1012_v13 }
  0xea   : > { %v1873_v40 = vpack.c.bf16 %v1862_v38, %v1858_v35  ;;  %v647_v42 = vmul.f32 %v1826_v41, %v635_v39  ;;  %1453 = vmatmul.msk.bf16.gmra.mxu0 %vm671_vm3, %v1867_v20 }
  0xeb   : > { %1466 = vmatmul.msk.bf16.gmra.mxu2 %vm671_vm3, %v1869_v12 }
  0xec   : > { %1471 = vmatmul.msk.bf16.gmra.mxu3 %vm671_vm3, %v1873_v40  ;;  %v659_v45 = vadd.f32 %v1831_v43, %v647_v42 }
  0xed   : > { %v553_v47 = vpop.f32.mrf.mxu2 }
  0xee   : > { %v623_v48 = vpop.f32.mrf.mxu3  ;;  %v667_v49 = vmax.f32 %v659_v45, 0.0  ;;  %v566_v50 = vadd.f32 %v553_v47, %v492_v5  ;;  %v1085_v45 = vpack.c.bf16 %v1858_v35, %v1840_v1 }
  0xef   : > { %v1014_v51 = vld [vmem:[#allocation3 + $0x41] sm:$0xff] }
  0xf0   : > { %698 = vst.msk [vmem:[#allocation3 + $0x51] sm:$0xff] %vm671_vm3, %v667_v49  ;;  %v636_v52 = vadd.f32 %v623_v48, %v566_v50  ;;  %v1020_v53 = vpack.c.bf16 %v1014_v51, %v816_v37  ;;  %v712_v61 = vld [vmem:[#allocation3 + $0x40] sm:$0xff]  ;;  %v1945_v48 = vpop.f32.mrf.mxu1 }
  0xf1   : > { %v883_v62 = vld [vmem:[#allocation3 + $0x42] sm:$0xff]  ;;  %v954_v46 = vpack.c.bf16 %v712_v61, %v1860_v36 }
  0xf2   : > { %v648_v54 = vmul.f32 %v1826_v41, %v636_v52  ;;  %1481 = vmatmul.msk.bf16.gmra.mxu1 %vm671_vm3, %v1020_v53  ;;  %v1086_v47 = vpack.c.bf16 %v883_v62, %v1862_v38  ;;  %v1283_v52 = vld [vmem:[#allocation3 + $0x92] sm:$0xff] }
  0xf4   : > { %v660_v56 = vadd.f32 %v1831_v43, %v648_v54 }
  0xf5   : > { %v556_v57 = vpop.f32.mrf.mxu2 }
  0xf6   : > { %v626_v58 = vpop.f32.mrf.mxu3  ;;  %v668_v59 = vmax.f32 %v660_v56, 0.0  ;;  %v567_v60 = vadd.f32 %v556_v57, %v495_v55 }
  0xf7   : > { %v1899_v0 = vld [vmem:[#allocation3 + $0x50] sm:$0xff] }
  0xf8   : > { %v818_v3 = vld [vmem:[#allocation3 + $0x51] sm:$0xff]  ;;  %699 = vst.msk [vmem:[#allocation3 + $0x61] sm:$0xff] %vm671_vm3, %v668_v59  ;;  %v637_v7 = vadd.f32 %v626_v58, %v567_v60  ;;  %v718_v2 = vpack.c.bf16 %v1899_v0, %v712_v61 }
  0xf9   : > { %v1901_v4 = vld [vmem:[#allocation3 + $0x52] sm:$0xff]  ;;  %v1905_v17 = vpack.c.bf16 %v818_v3, %v1014_v51 }
  0xfa   : > { %v889_v22 = vpack.c.bf16 %v1901_v4, %v883_v62  ;;  %v649_v8 = vmul.f32 %v1826_v41, %v637_v7  ;;  %1454 = vmatmul.msk.bf16.gmra.mxu0 %vm671_vm3, %v718_v2 }
  0xfb   : > { %1467 = vmatmul.msk.bf16.gmra.mxu2 %vm671_vm3, %v1905_v17 }
  0xfc   : > { %1472 = vmatmul.msk.bf16.gmra.mxu3 %vm671_vm3, %v889_v22  ;;  %v661_v11 = vadd.f32 %v1831_v43, %v649_v8 }
  0xfd   : > { %v558_v18 = vpop.f32.mrf.mxu2 }
  0xfe   : > { %v669_v19 = vmax.f32 %v661_v11, 0.0  ;;  %v568_v13 = vadd.f32 %v558_v18, %v497_v10  ;;  %v628_v23 = vpop.f32.mrf.mxu3 }
  0xff   : > { %v1016_v24 = vld [vmem:[#allocation3 + $0x61] sm:$0xff] }
 0x100   : > { %700 = vst.msk [vmem:[#allocation3 + $0x71] sm:$0xff] %vm671_vm3, %v669_v19  ;;  %v638_v25 = vadd.f32 %v628_v23, %v568_v13  ;;  %v1021_v26 = vpack.c.bf16 %v1016_v24, %v818_v3  ;;  %v714_v28 = vld [vmem:[#allocation3 + $0x60] sm:$0xff] }
 0x101   : > { %v885_v31 = vld [vmem:[#allocation3 + $0x62] sm:$0xff]  ;;  %v955_v1 = vpack.c.bf16 %v714_v28, %v1899_v0 }
 0x102   : > { %v650_v27 = vmul.f32 %v1826_v41, %v638_v25  ;;  %1482 = vmatmul.msk.bf16.gmra.mxu1 %vm671_vm3, %v1021_v26 }
 0x104   : > { %v662_v29 = vadd.f32 %v1831_v43, %v650_v27  ;;  %v953_v43 = vpack.c.bf16 %v1856_v34, %v1838_v63  ;;  %v1951_v63 = vpop.f32.mrf.mxu1  ;;  %v1087_v34 = vpack.c.bf16 %v885_v31, %v1901_v4 }
 0x106   : > { %v670_v30 = vmax.f32 %v662_v29, 0.0 }
 0x107   : > { %v715_v32 = vld [vmem:[#allocation3 + $0x70] sm:$0xff] }
 0x108   : > { %v820_v33 = vld [vmem:[#allocation3 + $0x71] sm:$0xff]  ;;  %701 = vst.msk [vmem:[#allocation3 + $0x81] sm:$0xff] %vm671_vm3, %v670_v30  ;;  %v719_v39 = vpack.c.bf16 %v715_v32, %v714_v28 }
 0x109   : > { %v886_v37 = vld [vmem:[#allocation3 + $0x72] sm:$0xff]  ;;  %v824_v42 = vpack.c.bf16 %v820_v33, %v1016_v24 }
 0x10a   : > { %v890_v44 = vpack.c.bf16 %v886_v37, %v885_v31  ;;  %1455 = vmatmul.msk.bf16.gmra.mxu0 %vm671_vm3, %v719_v39 }
 0x10b   : > { %1468 = vmatmul.msk.bf16.gmra.mxu2 %vm671_vm3, %v824_v42 }
 0x10c   : > { %1473 = vmatmul.msk.bf16.gmra.mxu3 %vm671_vm3, %v890_v44  ;;  %v1958_v35 = vpop.f32.mrf.mxu1 }
 0x10f   : > { %v1018_v41 = vld [vmem:[#allocation3 + $0x81] sm:$0xff] }
 0x110   : > { %v1022_v5 = vpack.c.bf16 %v1018_v41, %v820_v33  ;;  %v952_v36 = vld [vmem:[#allocation3 + $0x80] sm:$0xff] }
 0x111   : > { %v1084_v38 = vld [vmem:[#allocation3 + $0x82] sm:$0xff]  ;;  %v956_v49 = vpack.c.bf16 %v952_v36, %v715_v32 }
 0x112   : > { %1483 = vmatmul.msk.bf16.gmra.mxu1 %vm671_vm3, %v1022_v5  ;;  %v1088_v50 = vpack.c.bf16 %v1084_v38, %v886_v37  ;;  %v1287_v53 = vpack.c.bf16 %v1283_v52, %v1084_v38 }
 0x11a   : > { %1475 = vmatmul.msk.bf16.vlgmr.msra.gmra.mxu0 %vm671_vm3, %v953_v43 }
 0x11b   : > { %1485 = vmatmul.msk.bf16.vlgmr.msrb.gmra.mxu2 %vm671_vm3, %v1085_v45 }
 0x11c   : > { %1490 = vmatmul.msk.bf16.vlgmr.msrb.gmra.mxu3 %vm671_vm3, %v1867_v20  ;;  %v1151_v20 = vld [vmem:[#allocation3 + $0x90] sm:$0xff] }
 0x11d   : > { %v1155_v51 = vpack.c.bf16 %v1151_v20, %v952_v36 }
 0x122   : > { %1500 = vmatmul.msk.bf16.vlgmr.msrb.gmra.mxu1 %vm671_vm3, %v1873_v40  ;;  %v1961_v40 = vpop.f32.mrf.mxu1 }
 0x12a   : > { %1476 = vmatmul.msk.bf16.gmra.mxu0 %vm671_vm3, %v954_v46  ;;  %v1966_v54 = vpop.f32.mrf.mxu1 }
 0x12b   : > { %1486 = vmatmul.msk.bf16.gmra.mxu2 %vm671_vm3, %v1086_v47 }
 0x12c   : > { %1491 = vmatmul.msk.bf16.gmra.mxu3 %vm671_vm3, %v718_v2 }
 0x132   : > { %1501 = vmatmul.msk.bf16.gmra.mxu1 %vm671_vm3, %v889_v22  ;;  %v1971_v21 = vpop.f32.mrf.mxu1  ;;  %v1217_v22 = vld [vmem:[#allocation3 + $0x91] sm:$0xff] }
 0x13a   : > { %1477 = vmatmul.msk.bf16.gmra.mxu0 %vm671_vm3, %v955_v1  ;;  %v1973_v56 = vpop.f32.mrf.mxu1 }
 0x13b   : > { %1487 = vmatmul.msk.bf16.gmra.mxu2 %vm671_vm3, %v1087_v34 }
 0x13c   : > { %1492 = vmatmul.msk.bf16.gmra.mxu3 %vm671_vm3, %v719_v39 }
 0x142   : > { %1502 = vmatmul.msk.bf16.gmra.mxu1 %vm671_vm3, %v890_v44  ;;  %v810_v59 = vpop.f32.mrf.mxu1 }
 0x14a   : > { %1478 = vmatmul.msk.bf16.gmra.mxu0 %vm671_vm3, %v956_v49 }
 0x14b   : > { %1488 = vmatmul.msk.bf16.gmra.mxu2 %vm671_vm3, %v1088_v50 }
 0x14c   : > { %1493 = vmatmul.msk.bf16.gmra.mxu3 %vm671_vm3, %v1155_v51 }
 0x152   : > { %1503 = vmatmul.msk.bf16.gmra.mxu1 %vm671_vm3, %v1287_v53 }
 0x157   : > { %v746_v16 = vpop.f32.mrf.mxu0 }
 0x158   : > { %v794_v43 = vadd.f32 %v1945_v48, %v746_v16 }
 0x15a   : > { %1495 = vmatmul.msk.bf16.vlgmr.msrb.gmra.mxu0 %vm671_vm3, %v1869_v12 }
 0x15e   : > { %v851_v60 = vpop.f32.mrf.mxu2 }
 0x15f   : > { %v748_v55 = vpop.f32.mrf.mxu0  ;;  %v917_v61 = vpop.f32.mrf.mxu3  ;;  %v871_v45 = vadd.f32 %v851_v60, %v794_v43 }
 0x160   : > { %v1049_v0 = vpop.f32.mrf.mxu1  ;;  %v796_v38 = vadd.f32 %v1951_v63, %v748_v55 }
 0x161   : > { %v937_v1 = vadd.f32 %v917_v61, %v871_v45 }
 0x166   : > { %v853_v12 = vpop.f32.mrf.mxu2 }
 0x167   : > { %v751_v57 = vpop.f32.mrf.mxu0  ;;  %v919_v4 = vpop.f32.mrf.mxu3  ;;  %v872_v49 = vadd.f32 %v853_v12, %v796_v38 }
 0x168   : > { %v1051_v7 = vpop.f32.mrf.mxu1  ;;  %v799_v48 = vadd.f32 %v1958_v35, %v751_v57 }
 0x169   : > { %v938_v53 = vadd.f32 %v919_v4, %v872_v49 }
 0x16a   : > { %1496 = vmatmul.msk.bf16.gmra.mxu0 %vm671_vm3, %v1905_v17  ;;  %v1221_v17 = vpack.c.bf16 %v1217_v22, %v1018_v41 }
 0x16e   : > { %v856_v2 = vpop.f32.mrf.mxu2 }
 0x16f   : > { %v1977_v58 = vpop.f32.mrf.mxu0  ;;  %v922_v6 = vpop.f32.mrf.mxu3 }
 0x170   : > { %v1054_v9 = vpop.f32.mrf.mxu1  ;;  %v801_v35 = vadd.f32 %v1961_v40, %v1977_v58 }
 0x176   : > { %v858_v10 = vpop.f32.mrf.mxu2 }
 0x177   : > { %v1979_v62 = vpop.f32.mrf.mxu0  ;;  %v924_v15 = vpop.f32.mrf.mxu3  ;;  %v874_v4 = vadd.f32 %v858_v10, %v801_v35 }
 0x178   : > { %v1989_v19 = vpop.f32.mrf.mxu1 }
 0x17a   : > { %1497 = vmatmul.msk.bf16.gmra.mxu0 %vm671_vm3, %v824_v42 }
 0x17e   : > { %v1991_v13 = vpop.f32.mrf.mxu2 }
 0x17f   : > { %v1982_v3 = vpop.f32.mrf.mxu0  ;;  %v1993_v23 = vpop.f32.mrf.mxu3 }
 0x180   : > { %v1995_v25 = vpop.f32.mrf.mxu1 }
 0x186   : > { %v1997_v26 = vpop.f32.mrf.mxu2 }
 0x187   : > { %v1984_v8 = vpop.f32.mrf.mxu0  ;;  %v1999_v29 = vpop.f32.mrf.mxu3 }
 0x188   : > { %v2001_v30 = vpop.f32.mrf.mxu1 }
 0x18a   : > { %1498 = vmatmul.msk.bf16.gmra.mxu0 %vm671_vm3, %v1221_v17  ;;  %v873_v17 = vadd.f32 %v856_v2, %v799_v48 }
 0x18c   : > { %v939_v63 = vadd.f32 %v922_v6, %v873_v17 }
 0x18e   : > { %v2003_v28 = vpop.f32.mrf.mxu2 }
 0x18f   : > { %v763_v11 = vpop.f32.mrf.mxu0  ;;  %v2005_v32 = vpop.f32.mrf.mxu3 }
 0x190   : > { %v1987_v14 = vadd.f32 %v810_v59, %v763_v11  ;;  %v2007_v33 = vpop.f32.mrf.mxu1 }
 0x196   : > { %v2009_v37 = vpop.f32.mrf.mxu2 }
 0x197   : > { %v983_v18 = vpop.f32.mrf.mxu0  ;;  %v2011_v42 = vpop.f32.mrf.mxu3 }
 0x198   : > { %v2015_v41 = vpop.f32.mrf.mxu1  ;;  %v1003_v20 = vadd.f32 %v983_v18, %v937_v1  ;;  %v940_v1 = vadd.f32 %v924_v15, %v874_v4 }
 0x19a   : > { %v1069_v51 = vadd.f32 %v1049_v0, %v1003_v20 }
 0x19e   : > { %v1115_v5 = vpop.f32.mrf.mxu2 }
 0x19f   : > { %v985_v24 = vpop.f32.mrf.mxu0  ;;  %v1182_v46 = vpop.f32.mrf.mxu3  ;;  %v1135_v59 = vadd.f32 %v1115_v5, %v1069_v51 }
 0x1a0   : > { %v1314_v34 = vpop.f32.mrf.mxu1  ;;  %v1004_v16 = vadd.f32 %v985_v24, %v938_v53 }
 0x1a1   : > { %v1202_v61 = vadd.f32 %v1182_v46, %v1135_v59 }
 0x1a2   : > { %v1070_v43 = vadd.f32 %v1051_v7, %v1004_v16 }
 0x1a6   : > { %v1117_v36 = vpop.f32.mrf.mxu2 }
 0x1a7   : > { %v988_v27 = vpop.f32.mrf.mxu0  ;;  %v1184_v52 = vpop.f32.mrf.mxu3  ;;  %v1136_v55 = vadd.f32 %v1117_v36, %v1070_v43 }
 0x1a8   : > { %v1316_v60 = vpop.f32.mrf.mxu1  ;;  %v1005_v57 = vadd.f32 %v988_v27, %v939_v63 }
 0x1a9   : > { %v1203_v7 = vadd.f32 %v1184_v52, %v1136_v55 }
 0x1aa   : > { %v1071_v5 = vadd.f32 %v1054_v9, %v1005_v57 }
 0x1ae   : > { %v1120_v22 = vpop.f32.mrf.mxu2 }
 0x1af   : > { %v990_v31 = vpop.f32.mrf.mxu0  ;;  %v1187_v12 = vpop.f32.mrf.mxu3  ;;  %v1137_v38 = vadd.f32 %v1120_v22, %v1071_v5 }
 0x1b0   : > { %v1319_v2 = vpop.f32.mrf.mxu1  ;;  %v1006_v36 = vadd.f32 %v990_v31, %v940_v1 }
 0x1b1   : > { %v1204_v10 = vadd.f32 %v1187_v12, %v1137_v38 }
 0x1b2   : > { %v1072_v20 = vadd.f32 %v1989_v19, %v1006_v36 }
 0x1b6   : > { %v1122_v18 = vpop.f32.mrf.mxu2 }
 0x1b7   : > { %v993_v39 = vpop.f32.mrf.mxu0  ;;  %v1189_v40 = vpop.f32.mrf.mxu3  ;;  %v1138_v52 = vadd.f32 %v1122_v18, %v1072_v20 }
 0x1b8   : > { %v1321_v49 = vpop.f32.mrf.mxu1 }
 0x1b9   : > { %v1205_v31 = vadd.f32 %v1189_v40, %v1138_v52 }
 0x1be   : > { %v1125_v51 = vpop.f32.mrf.mxu2 }
 0x1bf   : > { %v2013_v44 = vpop.f32.mrf.mxu0  ;;  %v1192_v59 = vpop.f32.mrf.mxu3 }
 0x1c0   : > { %v1324_v22 = vpop.f32.mrf.mxu1 }
 0x1c7   : > { %v2018_v47 = vpop.f32.mrf.mxu0 }
 0x1cf   : > { %v2021_v50 = vpop.f32.mrf.mxu0 }
 0x1d7   : > { %v1248_v11 = vpop.f32.mrf.mxu0 }
 0x1d8   : > { %v1268_v45 = vadd.f32 %v1248_v11, %v1202_v61  ;;  %v1127_v61 = vpop.f32.mrf.mxu2 }
 0x1da   : > { %v1334_v0 = vadd.f32 %v1314_v34, %v1268_v45  ;;  %v804_v34 = vadd.f32 %v1966_v54, %v1979_v62  ;;  %v806_v54 = vadd.f32 %v1971_v21, %v1982_v3  ;;  %v809_v21 = vadd.f32 %v1973_v56, %v1984_v8  ;;  %v1326_v56 = vpop.f32.mrf.mxu1 }
 0x1dc   : > { %1342 = vst.msk [vmem:[%s2029_s10] sm:$0xff] %vm671_vm3, %v1334_v0  ;;  %v875_v58 = vadd.f32 %v1991_v13, %v804_v34  ;;  %v876_v13 = vadd.f32 %v1997_v26, %v806_v54  ;;  %v877_v26 = vadd.f32 %v2003_v28, %v809_v21  ;;  %v878_v28 = vadd.f32 %v2009_v37, %v1987_v14 }
 0x1de   : > { %v941_v15 = vadd.f32 %v1993_v23, %v875_v58  ;;  %v943_v45 = vadd.f32 %v2005_v32, %v877_v26  ;;  %v944_v32 = vadd.f32 %v2011_v42, %v878_v28 }
 0x1df   : > { %v1250_v24 = vpop.f32.mrf.mxu0 }
 0x1e0   : > { %v1269_v46 = vadd.f32 %v1250_v24, %v1203_v7  ;;  %v1007_v62 = vadd.f32 %v993_v39, %v941_v15  ;;  %v1009_v0 = vadd.f32 %v2018_v47, %v943_v45  ;;  %v1130_v8 = vpop.f32.mrf.mxu2  ;;  %v1010_v47 = vadd.f32 %v2021_v50, %v944_v32 }
 0x1e2   : > { %v1335_v6 = vadd.f32 %v1316_v60, %v1269_v46  ;;  %v1073_v19 = vadd.f32 %v1995_v25, %v1007_v62  ;;  %v942_v60 = vadd.f32 %v1999_v29, %v876_v13  ;;  %v1194_v29 = vpop.f32.mrf.mxu3  ;;  %v1329_v18 = vpop.f32.mrf.mxu1  ;;  %v1076_v37 = vadd.f32 %v2015_v41, %v1010_v47 }
 0x1e4   : > { %1343 = vst.msk [vmem:[%s2029_s10 + $0x8] sm:$0xff] %vm671_vm3, %v1335_v6  ;;  %v1139_v23 = vadd.f32 %v1125_v51, %v1073_v19  ;;  %v1008_v3 = vadd.f32 %v2013_v44, %v942_v60 }
 0x1e6   : > { %v1206_v39 = vadd.f32 %v1192_v59, %v1139_v23  ;;  %v1074_v25 = vadd.f32 %v2001_v30, %v1008_v3  ;;  %v1075_v30 = vadd.f32 %v2007_v33, %v1009_v0 }
 0x1e7   : > { %v1253_v27 = vpop.f32.mrf.mxu0 }
 0x1e8   : > { %v1270_v9 = vadd.f32 %v1253_v27, %v1204_v10  ;;  %v1140_v63 = vadd.f32 %v1127_v61, %v1074_v25  ;;  %v1141_v57 = vadd.f32 %v1130_v8, %v1075_v30  ;;  %v1132_v24 = vpop.f32.mrf.mxu2 }
 0x1e9   : > { %v1142_v33 = vadd.f32 %v1132_v24, %v1076_v37 }
 0x1ea   : > { %v1336_v53 = vadd.f32 %v1319_v2, %v1270_v9  ;;  %v1207_v44 = vadd.f32 %v1194_v29, %v1140_v63  ;;  %v1197_v7 = vpop.f32.mrf.mxu3  ;;  %v1331_v34 = vpop.f32.mrf.mxu1 }
 0x1eb   : > { %v1208_v2 = vadd.f32 %v1197_v7, %v1141_v57 }
 0x1ec   : > { %1344 = vst.msk [vmem:[%s2029_s10 + $0x10] sm:$0xff] %vm671_vm3, %v1336_v53 }
 0x1ef   : > { %v1255_v48 = vpop.f32.mrf.mxu0 }
 0x1f0   : > { %v1271_v16 = vadd.f32 %v1255_v48, %v1205_v31 }
 0x1f2   : > { %v1337_v17 = vadd.f32 %v1321_v49, %v1271_v16  ;;  %v1199_v42 = vpop.f32.mrf.mxu3 }
 0x1f3   : > { %v1209_v1 = vadd.f32 %v1199_v42, %v1142_v33 }
 0x1f4   : > { %1345 = vst.msk [vmem:[%s2029_s10 + $0x18] sm:$0xff] %vm671_vm3, %v1337_v17 }
 0x1f7   : > { %v1258_v11 = vpop.f32.mrf.mxu0 }
 0x1f8   : > { %v1272_v43 = vadd.f32 %v1258_v11, %v1206_v39 }
 0x1fa   : > { %v1338_v55 = vadd.f32 %v1324_v22, %v1272_v43 }
 0x1fc   : > { %1346 = vst.msk [vmem:[%s2029_s10 + $0x20] sm:$0xff] %vm671_vm3, %v1338_v55 }
 0x1ff   : > { %v1260_v12 = vpop.f32.mrf.mxu0 }
 0x200   : > { %v1273_v35 = vadd.f32 %v1260_v12, %v1207_v44 }
 0x202   : > { %v1339_v4 = vadd.f32 %v1326_v56, %v1273_v35 }
 0x204   : > { %1347 = vst.msk [vmem:[%s2029_s10 + $0x28] sm:$0xff] %vm671_vm3, %v1339_v4 }
 0x207   : > { %v1263_v14 = vpop.f32.mrf.mxu0 }
 0x208   : > { %v1274_v5 = vadd.f32 %v1263_v14, %v1208_v2 }
 0x20a   : > { %v1340_v46 = vadd.f32 %v1329_v18, %v1274_v5 }
 0x20c   : > { %1348 = vst.msk [vmem:[%s2029_s10 + $0x30] sm:$0xff] %vm671_vm3, %v1340_v46 }
 0x20f   : > { %v1265_v38 = vpop.f32.mrf.mxu0 }
 0x210   : > { %v1275_v6 = vadd.f32 %v1265_v38, %v1209_v1 }
 0x212   : > { %v1341_v50 = vadd.f32 %v1331_v34, %v1275_v6 }
 0x214   : > { %1349 = vst.msk [vmem:[%s2029_s10 + $0x38] sm:$0xff] %vm671_vm3, %v1341_v50 }
 0x215 PF: > { %s18_s27 = sadd.s32 1, %s1534_s27  }
 0x216   : > { %p15_p4 = scmp.ge.s32.totalorder %s18_s27, 4  }
 0x218   :  { %17 = sbr.rel (!%p15_p4) target bundleno = 1 (0x1), region = 96 }

</bundles_post_ra>
